<compile_context>
chip_gen: v7x
topology: tpu7x:2x2x1
jax: 0.10.0
libtpu: 0.0.40
codegen_flags: <defaults>
</compile_context>

<pallas_src>
import functools

import numpy as np
import jax
import jax.numpy as jnp
from jax import lax
from jax.experimental import pallas as pl
from jax.experimental.pallas import tpu as pltpu


# ----------------------------- kernels -------------------------------------- #
def txt_tower_kernel(scale_ref,            # SMEM (1,1) f32: clamp(exp(temperature))
                     txt_ref,              # VMEM [B, D_txt_in] bf16
                     w_enc_ref, b_enc_ref, # VMEM [D_txt_in, dim_text] bf16, [1, dim_text] f32
                     w_mm_ref,             # VMEM [dim_text, E] bf16
                     txt_f_ref):           # VMEM [B, E] bf16 (normalized, scale folded)
    h = jnp.dot(txt_ref[...], w_enc_ref[...],
                preferred_element_type=jnp.float32) + b_enc_ref[...]
    e = jnp.dot(h.astype(jnp.bfloat16), w_mm_ref[...],
                preferred_element_type=jnp.float32)
    # F.normalize(x, 2, dim=1) == x * rsqrt(max(||x||^2, eps^2)), eps=1e-12 (EUP rsqrt)
    inv = lax.rsqrt(jnp.maximum(jnp.sum(e * e, axis=1, keepdims=True), 1e-24))
    # Temperature folded into the (once-computed) text features, not per image tile.
    txt_f_ref[...] = (e * (inv * scale_ref[0, 0])).astype(jnp.bfloat16)


def clip_img_kernel(img_ref,               # VMEM [tile_b, tile_k] bf16
                    w_enc_ref,             # VMEM [tile_k, dim_img] bf16
                    b_enc_ref,             # VMEM [1, dim_img] f32      (grid-invariant)
                    w_mm_ref,              # VMEM [dim_img, E] bf16     (grid-invariant)
                    txt_ft_ref,            # VMEM [E, B] bf16           (grid-invariant)
                    logits_ref,            # VMEM [tile_b, B] f32
                    acc_ref):              # VMEM scratch [tile_b, dim_img] f32
    k = pl.program_id(1)

    @pl.when(k == 0)
    def _init():
        acc_ref[...] = jnp.zeros_like(acc_ref)

    # K-tiled image-encoder matmul, f32 accumulation across the K grid axis.
    acc_ref[...] += jnp.dot(img_ref[...], w_enc_ref[...],
                            preferred_element_type=jnp.float32)

    @pl.when(k == pl.num_programs(1) - 1)
    def _epilogue():
        img_h = acc_ref[...] + b_enc_ref[...]
        img_e = jnp.dot(img_h.astype(jnp.bfloat16), w_mm_ref[...],
                        preferred_element_type=jnp.float32)
        inv = lax.rsqrt(jnp.maximum(jnp.sum(img_e * img_e, axis=1, keepdims=True), 1e-24))
        img_f = (img_e * inv).astype(jnp.bfloat16)
        # Similarity: plain MXU matmul against the pre-transposed text features
        # (scale already folded into txt_fT); lane-dense [tile_b, B] f32 store.
        logits_ref[...] = jnp.dot(img_f, txt_ft_ref[...],
                                  preferred_element_type=jnp.float32)


# --------------------------- tiling heuristics ------------------------------- #
def _vmem_budget_and_limit():
    cap = 64 * 1024 * 1024
    try:
        cap = int(pltpu.get_tpu_info().vmem_capacity_bytes)
    except Exception:
        pass
    # Explicit scoped limit (defaults are 16/32 MiB, far below physical on v5e/v6e).
    vmem_limit = max(min(cap * 3 // 4, 100 * 1024 * 1024), 32 * 1024 * 1024)
    # Budget Pallas-managed buffers at ~half of that (headroom for Mosaic internals).
    return vmem_limit // 2, vmem_limit


def _choose_tiles(B, d_img_in, dim_img, E, budget_bytes):
    # Grid-invariant residents (single-buffered): w_img_mm + txt_fT in bf16, bias f32.
    resident = 2 * (dim_img * E + E * B) + 4 * dim_img
    avail = max(budget_bytes - resident, 1 << 20)

    # tile_b: f32 logits block + f32 accumulator must fit in ~half the budget.
    if B <= 8:
        tile_b = B
    else:
        tile_b = min(B, 512)
        tile_b = max(8, (tile_b // 8) * 8)
        while tile_b > 8 and 4 * tile_b * (B + dim_img) > avail // 2:
            tile_b = max(8, (tile_b // 16) * 8)
        # Prefer >= 2 batch tiles so the "parallel" axis can shard across v7x's 2 TCs.
        if tile_b == B and B % 16 == 0:
            tile_b = B // 2
    num_b = pl.cdiv(B, tile_b)

    # tile_k: two pipeline buffers of the K-varying bf16 operands must fit; always
    # split K when it is large so the dominant matmul gets DMA/compute overlap.
    k_avail = avail - 4 * tile_b * (B + dim_img)
    if d_img_in <= 512:
        tile_k = d_img_in
    else:
        tile_k = None
        for cand in (4096, 2048, 1024, 512, 256, 128):
            if cand >= d_img_in or d_img_in % cand:
                continue
            if 2 * 2 * cand * (tile_b + dim_img) <= k_avail:
                tile_k = cand
                break
        if tile_k is None:
            # TODO(synk): mask a ragged K remainder instead of whole-K residency.
            tile_k = d_img_in
    num_k = pl.cdiv(d_img_in, tile_k)
    return tile_b, num_b, tile_k, num_k


# ------------------------------- wrapper ------------------------------------- #
def clip_forward(image, text, params, temperature_log, *, single_buffer_weights=True):
    """image: [B, C, H, W] f32 (NCHW), text: [B, D_txt_in] f32."""
    B = image.shape[0]
    img_flat = image.reshape(B, -1)          # matches torch .view(B, -1)

    D_img_in = img_flat.shape[1]
    D_txt_in = text.shape[1]
    dim_img = params["w_img_enc"].shape[1]
    dim_text = params["w_txt_enc"].shape[1]
    E = params["w_img_mm"].shape[1]

    bf16 = jnp.bfloat16
    img_bf = img_flat.astype(bf16)
    txt_bf = text.astype(bf16)
    w_img_enc = params["w_img_enc"].astype(bf16)
    w_txt_enc = params["w_txt_enc"].astype(bf16)
    w_img_mm = params["w_img_mm"].astype(bf16)
    w_txt_mm = params["w_txt_mm"].astype(bf16)
    b_img_enc = params["b_img_enc"].astype(jnp.float32)
    b_txt_enc = params["b_txt_enc"].astype(jnp.float32)

    # clamp(exp(temperature), 0.01, 100.0) scalar, fed via SMEM to the text tower.
    scale = jnp.clip(jnp.exp(temperature_log), 0.01, 100.0).reshape(1, 1).astype(jnp.float32)

    budget, vmem_limit = _vmem_budget_and_limit()
    vmem = pltpu.MemorySpace.VMEM
    smem = pltpu.MemorySpace.SMEM

    # -------- text tower: computed ONCE (no per-image-tile recompute) --------
    txt_cost = pl.CostEstimate(
        flops=2 * B * (D_txt_in * dim_text + dim_text * E),
        transcendentals=B,
        bytes_accessed=2 * (B * D_txt_in + D_txt_in * dim_text + dim_text * E + E * B)
                       + 4 * (dim_text + 1))
    txt_f = pl.pallas_call(
        txt_tower_kernel,
        out_shape=jax.ShapeDtypeStruct((B, E), bf16),
        in_specs=[pl.BlockSpec(memory_space=smem),
                  pl.BlockSpec(memory_space=vmem),
                  pl.BlockSpec(memory_space=vmem),
                  pl.BlockSpec(memory_space=vmem),
                  pl.BlockSpec(memory_space=vmem)],
        out_specs=pl.BlockSpec(memory_space=vmem),
        compiler_params=pltpu.CompilerParams(vmem_limit_bytes=vmem_limit),
        cost_estimate=txt_cost,
    )(scale, txt_bf, w_txt_enc, b_txt_enc, w_txt_mm)

    # One-time pre-transpose (cheap XLA op) so the per-tile similarity is a plain
    # jnp.dot with its contraction on the natural last/first dims.
    txt_ft = txt_f.T                                           # [E, B] bf16

    # -------- image tower + similarity: batch- and K-tiled ------------------
    tile_b, num_b, tile_k, num_k = _choose_tiles(B, D_img_in, dim_img, E, budget)

    def const_spec(shape):
        # Grid-invariant operands: single-buffered to halve their VMEM footprint.
        if single_buffer_weights:
            return pl.BlockSpec(shape, lambda i, k: (0, 0), pipeline_mode=pl.Buffered(1))
        return pl.BlockSpec(shape, lambda i, k: (0, 0))

    in_specs = [
        pl.BlockSpec((tile_b, tile_k), lambda i, k: (i, k)),    # image rows, K slab
        pl.BlockSpec((tile_k, dim_img), lambda i, k: (k, 0)),   # w_img_enc K slab
        const_spec((1, dim_img)),                               # b_img_enc
        const_spec((dim_img, E)),                               # w_img_mm
        const_spec((E, B)),                                     # txt_fT
    ]
    out_specs = pl.BlockSpec((tile_b, B), lambda i, k: (i, 0))

    img_cost = pl.CostEstimate(
        flops=2 * B * (D_img_in * dim_img + dim_img * E + B * E),
        transcendentals=B,
        bytes_accessed=2 * (B * D_img_in + num_b * D_img_in * dim_img
                            + dim_img * E + E * B)
                       + 4 * (dim_img + B * B))

    logits_img = pl.pallas_call(
        clip_img_kernel,
        out_shape=jax.ShapeDtypeStruct((B, B), jnp.float32),
        grid=(num_b, num_k),
        in_specs=in_specs,
        out_specs=out_specs,
        scratch_shapes=[pltpu.VMEM((tile_b, dim_img), jnp.float32)],
        compiler_params=pltpu.CompilerParams(
            dimension_semantics=("parallel", "arbitrary"),
            vmem_limit_bytes=vmem_limit),
        cost_estimate=img_cost,
    )(img_bf, w_img_enc, b_img_enc, w_img_mm, txt_ft)

    # logits_text = logits_images.T — free in the wrapper, no second [B,B] writeback.
    return logits_img, logits_img.T


# ------------------------------ references ----------------------------------- #
def clip_forward_ref_f32(image, text, params, temperature_log):
    """Pure-f32 mirror of the PyTorch module semantics."""
    B = image.shape[0]
    img_flat = image.reshape(B, -1)
    img_h = img_flat @ params["w_img_enc"] + params["b_img_enc"]
    txt_h = text @ params["w_txt_enc"] + params["b_txt_enc"]
    img_e = img_h @ params["w_img_mm"]
    txt_e = txt_h @ params["w_txt_mm"]
    img_f = img_e / jnp.maximum(jnp.linalg.norm(img_e, axis=1, keepdims=True), 1e-12)
    txt_f = txt_e / jnp.maximum(jnp.linalg.norm(txt_e, axis=1, keepdims=True), 1e-12)
    scale = jnp.clip(jnp.exp(temperature_log), 0.01, 100.0)
    li = (img_f @ txt_f.T) * scale
    return li, li.T


def clip_forward_ref_bf16(image, text, params, temperature_log):
    """Mirrors the kernel datapath (bf16 MXU matmuls, f32 accum, f32 epilogue)."""
    bf, f32 = jnp.bfloat16, jnp.float32
    B = image.shape[0]
    x = image.reshape(B, -1).astype(bf)
    t = text.astype(bf)
    img_h = jnp.dot(x, params["w_img_enc"].astype(bf),
                    preferred_element_type=f32) + params["b_img_enc"]
    img_e = jnp.dot(img_h.astype(bf), params["w_img_mm"].astype(bf),
                    preferred_element_type=f32)
    txt_h = jnp.dot(t, params["w_txt_enc"].astype(bf),
                    preferred_element_type=f32) + params["b_txt_enc"]
    txt_e = jnp.dot(txt_h.astype(bf), params["w_txt_mm"].astype(bf),
                    preferred_element_type=f32)
    inv_i = lax.rsqrt(jnp.maximum(jnp.sum(img_e * img_e, axis=1, keepdims=True), 1e-24))
    inv_t = lax.rsqrt(jnp.maximum(jnp.sum(txt_e * txt_e, axis=1, keepdims=True), 1e-24))
    scale = jnp.clip(jnp.exp(temperature_log), 0.01, 100.0)
    img_f = (img_e * inv_i).astype(bf)
    txt_f = (txt_e * (inv_t * scale)).astype(bf)
    li = jnp.dot(img_f, txt_f.T, preferred_element_type=f32)
    return li, li.T


# --------------------------------- main --------------------------------------- #
if __name__ == "__main__":
    # Small shapes consistent with the module's forward (image_encoder/text_encoder
    # are injected black boxes in the spec; synthesized as single Linear layers).
    B, C, H, W = 8, 4, 16, 16
    D_img_in = C * H * W       # flattened image pixels -> image_encoder input
    D_txt_in = 32              # synthetic text feature dim -> text_encoder input
    dim_img = 64               # image_encoder output dim
    dim_text = 64              # text_encoder output dim
    embedding_dim = 32         # shared multimodal embedding dim
    temperature = 0.07
    temperature_log = jnp.float32(np.log(1.0 / temperature))

    key = jax.random.PRNGKey(0)
    k_img, k_txt, k1, k2, k3, k4, k5, k6 = jax.random.split(key, 8)

    image = jax.random.normal(k_img, (B, C, H, W), dtype=jnp.float32)
    text = jax.random.normal(k_txt, (B, D_txt_in), dtype=jnp.float32)

    params = {
        # encoder Linear weights stored as [in, out] (pre-transposed nn.Linear)
        "w_img_enc": jax.random.normal(k1, (D_img_in, dim_img), jnp.float32) * 0.02,
        "b_img_enc": jax.random.normal(k2, (1, dim_img), jnp.float32) * 0.02,
        "w_txt_enc": jax.random.normal(k3, (D_txt_in, dim_text), jnp.float32) * 0.02,
        "b_txt_enc": jax.random.normal(k4, (1, dim_text), jnp.float32) * 0.02,
        # bias-free multimodal projections
        "w_img_mm": jax.random.normal(k5, (dim_img, embedding_dim), jnp.float32) * 0.02,
        "w_txt_mm": jax.random.normal(k6, (dim_text, embedding_dim), jnp.float32) * 0.02,
    }

    try:
        li, lt = jax.jit(clip_forward)(image, text, params, temperature_log)
        jax.block_until_ready((li, lt))
    except Exception:
        # Fallback for Pallas builds without BlockSpec(pipeline_mode=pl.Buffered(1)):
        # identical math, default double-buffered weight operands.
        fwd = jax.jit(functools.partial(clip_forward, single_buffer_weights=False))
        li, lt = fwd(image, text, params, temperature_log)
        jax.block_until_ready((li, lt))

    # Tight check against a reference that mirrors the kernel's bf16 MXU datapath.
    li_ref, lt_ref = clip_forward_ref_bf16(image, text, params, temperature_log)
    np.testing.assert_allclose(np.asarray(li), np.asarray(li_ref), rtol=2e-2, atol=5e-2)
    np.testing.assert_allclose(np.asarray(lt), np.asarray(lt_ref), rtol=2e-2, atol=5e-2)

    # Looser check against the pure-f32 module semantics (bf16 matmul tolerance).
    li_f32, lt_f32 = clip_forward_ref_f32(image, text, params, temperature_log)
    np.testing.assert_allclose(np.asarray(li), np.asarray(li_f32), rtol=5e-2, atol=5e-1)
    np.testing.assert_allclose(np.asarray(lt), np.asarray(lt_f32), rtol=5e-2, atol=5e-1)

    assert li.shape == (B, B) and lt.shape == (B, B) and li.dtype == jnp.float32

    print("KERNEL_OK")
</pallas_src>

<mosaic_0001>
module attributes {stable_mosaic.version = 11 : i64} {
  func.func @txt_tower_kernel(%arg0: memref<1x1xf32, #tpu.memory_space<smem>>, %arg1: memref<8x32xbf16, #tpu.memory_space<vmem>>, %arg2: memref<32x64xbf16, #tpu.memory_space<vmem>>, %arg3: memref<1x64xf32, #tpu.memory_space<vmem>>, %arg4: memref<64x32xbf16, #tpu.memory_space<vmem>>, %arg5: memref<8x32xbf16, #tpu.memory_space<vmem>>) attributes {dimension_semantics = [], scalar_prefetch = 0 : i64, scratch_operands = 0 : i64, tpu.core_type = #tpu.core_type<tc>} {
    %c0 = arith.constant 0 : index
    %c0_0 = arith.constant 0 : index
    %0 = vector.load %arg1[%c0, %c0_0] : memref<8x32xbf16, #tpu.memory_space<vmem>>, vector<8x32xbf16>
    %c0_1 = arith.constant 0 : index
    %c0_2 = arith.constant 0 : index
    %1 = vector.load %arg2[%c0_1, %c0_2] : memref<32x64xbf16, #tpu.memory_space<vmem>>, vector<32x64xbf16>
    %cst = arith.constant dense<0.000000e+00> : vector<8x64xf32>
    %2 = tpu.matmul %0, %1, %cst {dimension_numbers = #tpu.dot_dimension_numbers<[1], [0], [0], [1], [0, 0, 1, 1], [], []>} : vector<8x32xbf16>, vector<32x64xbf16>, vector<8x64xf32> -> vector<8x64xf32>
    %c0_3 = arith.constant 0 : index
    %c0_4 = arith.constant 0 : index
    %3 = vector.load %arg3[%c0_3, %c0_4] : memref<1x64xf32, #tpu.memory_space<vmem>>, vector<1x64xf32>
    %4 = vector.broadcast %3 : vector<1x64xf32> to vector<8x64xf32>
    %5 = arith.addf %2, %4 : vector<8x64xf32>
    %6 = arith.truncf %5 : vector<8x64xf32> to vector<8x64xbf16>
    %c0_5 = arith.constant 0 : index
    %c0_6 = arith.constant 0 : index
    %7 = vector.load %arg4[%c0_5, %c0_6] : memref<64x32xbf16, #tpu.memory_space<vmem>>, vector<64x32xbf16>
    %cst_7 = arith.constant dense<0.000000e+00> : vector<8x32xf32>
    %8 = tpu.matmul %6, %7, %cst_7 {dimension_numbers = #tpu.dot_dimension_numbers<[1], [0], [0], [1], [0, 0, 1, 1], [], []>} : vector<8x64xbf16>, vector<64x32xbf16>, vector<8x32xf32> -> vector<8x32xf32>
    %9 = arith.mulf %8, %8 : vector<8x32xf32>
    %cst_8 = arith.constant dense<0.000000e+00> : vector<8xf32>
    %10 = vector.multi_reduction <add>, %9, %cst_8 [1] : vector<8x32xf32> to vector<8xf32>
    %11 = vector.shape_cast %10 : vector<8xf32> to vector<8x1xf32>
    %cst_9 = arith.constant 1.000000e-24 : f32
    %12 = vector.broadcast %cst_9 : f32 to vector<8x1xf32>
    %13 = arith.maximumf %11, %12 : vector<8x1xf32>
    %14 = math.rsqrt %13 : vector<8x1xf32>
    %c0_10 = arith.constant 0 : index
    %c0_11 = arith.constant 0 : index
    %15 = memref.load %arg0[%c0_10, %c0_11] : memref<1x1xf32, #tpu.memory_space<smem>>
    %16 = vector.broadcast %15 : f32 to vector<8x1xf32>
    %17 = arith.mulf %14, %16 : vector<8x1xf32>
    %18 = vector.broadcast %17 : vector<8x1xf32> to vector<8x32xf32>
    %19 = arith.mulf %8, %18 : vector<8x32xf32>
    %20 = arith.truncf %19 : vector<8x32xf32> to vector<8x32xbf16>
    %c0_12 = arith.constant 0 : index
    %c0_13 = arith.constant 0 : index
    %21 = vector.load %arg5[%c0_12, %c0_13] : memref<8x32xbf16, #tpu.memory_space<vmem>>, vector<8x32xbf16>
    tpu.vector_store %arg5[%c0_12, %c0_13], %20 {strides = array<i32>} : memref<8x32xbf16, #tpu.memory_space<vmem>>, vector<8x32xbf16>,
    return
  }
}

module attributes {stable_mosaic.version = 11 : i64} {
  func.func @clip_img_kernel(%arg0: i32, %arg1: i32, %arg2: memref<8x512xbf16, #tpu.memory_space<vmem>>, %arg3: memref<512x64xbf16, #tpu.memory_space<vmem>>, %arg4: memref<1x64xf32, #tpu.memory_space<vmem>>, %arg5: memref<64x32xbf16, #tpu.memory_space<vmem>>, %arg6: memref<32x8xbf16, #tpu.memory_space<vmem>>, %arg7: memref<8x8xf32, #tpu.memory_space<vmem>>, %arg8: memref<8x64xf32, #tpu.memory_space<vmem>>) attributes {dimension_semantics = [#tpu.dimension_semantics<parallel>, #tpu.dimension_semantics<arbitrary>], iteration_bounds = array<i64: 1, 2>, scalar_prefetch = 0 : i64, scratch_operands = 1 : i64, tpu.core_type = #tpu.core_type<tc>, window_params = [{transform_indices = @transform_0, window_bounds = array<i64: 8, 512>}, {transform_indices = @transform_1, window_bounds = array<i64: 512, 64>}, {pipeline_mode = #tpu.pipeline_mode<synchronous>, transform_indices = @transform_2, window_bounds = array<i64: 1, 64>}, {pipeline_mode = #tpu.pipeline_mode<synchronous>, transform_indices = @transform_3, window_bounds = array<i64: 64, 32>}, {pipeline_mode = #tpu.pipeline_mode<synchronous>, transform_indices = @transform_4, window_bounds = array<i64: 32, 8>}, {transform_indices = @transform_5, window_bounds = array<i64: 8, 8>}]} {
    %c0_i32 = arith.constant 0 : i32
    %0 = arith.cmpi eq, %arg1, %c0_i32 : i32
    %1 = arith.extui %0 : i1 to i32
    %c0_i32_0 = arith.constant 0 : i32
    %2 = arith.cmpi ne, %1, %c0_i32_0 : i32
    scf.if %2 {
      %cst_9 = arith.constant 0.000000e+00 : f32
      %12 = vector.broadcast %cst_9 : f32 to vector<8x64xf32>
      %c0_10 = arith.constant 0 : index
      %c0_11 = arith.constant 0 : index
      %13 = vector.load %arg8[%c0_10, %c0_11] : memref<8x64xf32, #tpu.memory_space<vmem>>, vector<8x64xf32>
      tpu.vector_store %arg8[%c0_10, %c0_11], %12 {strides = array<i32>} : memref<8x64xf32, #tpu.memory_space<vmem>>, vector<8x64xf32>,
    } else {
    }
    %c0 = arith.constant 0 : index
    %c0_1 = arith.constant 0 : index
    %3 = vector.load %arg8[%c0, %c0_1] : memref<8x64xf32, #tpu.memory_space<vmem>>, vector<8x64xf32>
    %c0_2 = arith.constant 0 : index
    %c0_3 = arith.constant 0 : index
    %4 = vector.load %arg2[%c0_2, %c0_3] : memref<8x512xbf16, #tpu.memory_space<vmem>>, vector<8x512xbf16>
    %c0_4 = arith.constant 0 : index
    %c0_5 = arith.constant 0 : index
    %5 = vector.load %arg3[%c0_4, %c0_5] : memref<512x64xbf16, #tpu.memory_space<vmem>>, vector<512x64xbf16>
    %cst = arith.constant dense<0.000000e+00> : vector<8x64xf32>
    %6 = tpu.matmul %4, %5, %cst {dimension_numbers = #tpu.dot_dimension_numbers<[1], [0], [0], [1], [0, 0, 1, 1], [], []>} : vector<8x512xbf16>, vector<512x64xbf16>, vector<8x64xf32> -> vector<8x64xf32>
    %7 = arith.addf %3, %6 : vector<8x64xf32>
    %c0_6 = arith.constant 0 : index
    %c0_7 = arith.constant 0 : index
    %8 = vector.load %arg8[%c0_6, %c0_7] : memref<8x64xf32, #tpu.memory_space<vmem>>, vector<8x64xf32>
    tpu.vector_store %arg8[%c0_6, %c0_7], %7 {strides = array<i32>} : memref<8x64xf32, #tpu.memory_space<vmem>>, vector<8x64xf32>,
    %c1_i32 = arith.constant 1 : i32
    %9 = arith.cmpi eq, %arg1, %c1_i32 : i32
    %10 = arith.extui %9 : i1 to i32
    %c0_i32_8 = arith.constant 0 : i32
    %11 = arith.cmpi ne, %10, %c0_i32_8 : i32
    scf.if %11 {
      %c0_9 = arith.constant 0 : index
      %c0_10 = arith.constant 0 : index
      %12 = vector.load %arg8[%c0_9, %c0_10] : memref<8x64xf32, #tpu.memory_space<vmem>>, vector<8x64xf32>
      %c0_11 = arith.constant 0 : index
      %c0_12 = arith.constant 0 : index
      %13 = vector.load %arg4[%c0_11, %c0_12] : memref<1x64xf32, #tpu.memory_space<vmem>>, vector<1x64xf32>
      %14 = vector.broadcast %13 : vector<1x64xf32> to vector<8x64xf32>
      %15 = arith.addf %12, %14 : vector<8x64xf32>
      %16 = arith.truncf %15 : vector<8x64xf32> to vector<8x64xbf16>
      %c0_13 = arith.constant 0 : index
      %c0_14 = arith.constant 0 : index
      %17 = vector.load %arg5[%c0_13, %c0_14] : memref<64x32xbf16, #tpu.memory_space<vmem>>, vector<64x32xbf16>
      %cst_15 = arith.constant dense<0.000000e+00> : vector<8x32xf32>
      %18 = tpu.matmul %16, %17, %cst_15 {dimension_numbers = #tpu.dot_dimension_numbers<[1], [0], [0], [1], [0, 0, 1, 1], [], []>} : vector<8x64xbf16>, vector<64x32xbf16>, vector<8x32xf32> -> vector<8x32xf32>
      %19 = arith.mulf %18, %18 : vector<8x32xf32>
      %cst_16 = arith.constant dense<0.000000e+00> : vector<8xf32>
      %20 = vector.multi_reduction <add>, %19, %cst_16 [1] : vector<8x32xf32> to vector<8xf32>
      %21 = vector.shape_cast %20 : vector<8xf32> to vector<8x1xf32>
      %cst_17 = arith.constant 1.000000e-24 : f32
      %22 = vector.broadcast %cst_17 : f32 to vector<8x1xf32>
      %23 = arith.maximumf %21, %22 : vector<8x1xf32>
      %24 = math.rsqrt %23 : vector<8x1xf32>
      %25 = vector.broadcast %24 : vector<8x1xf32> to vector<8x32xf32>
      %26 = arith.mulf %18, %25 : vector<8x32xf32>
      %27 = arith.truncf %26 : vector<8x32xf32> to vector<8x32xbf16>
      %c0_18 = arith.constant 0 : index
      %c0_19 = arith.constant 0 : index
      %28 = vector.load %arg6[%c0_18, %c0_19] : memref<32x8xbf16, #tpu.memory_space<vmem>>, vector<32x8xbf16>
      %cst_20 = arith.constant dense<0.000000e+00> : vector<8x8xf32>
      %29 = tpu.matmul %27, %28, %cst_20 {dimension_numbers = #tpu.dot_dimension_numbers<[1], [0], [0], [1], [0, 0, 1, 1], [], []>} : vector<8x32xbf16>, vector<32x8xbf16>, vector<8x8xf32> -> vector<8x8xf32>
      %c0_21 = arith.constant 0 : index
      %c0_22 = arith.constant 0 : index
      %30 = vector.load %arg7[%c0_21, %c0_22] : memref<8x8xf32, #tpu.memory_space<vmem>>, vector<8x8xf32>
      tpu.vector_store %arg7[%c0_21, %c0_22], %29 {strides = array<i32>} : memref<8x8xf32, #tpu.memory_space<vmem>>, vector<8x8xf32>,
    } else {
    }
    return
  }
  func.func @transform_0(%arg0: i32, %arg1: i32) -> (i32, i32) {
    %c0_i32 = arith.constant 0 : i32
    return %arg0, %arg1 : i32, i32
  }
  func.func @transform_1(%arg0: i32, %arg1: i32) -> (i32, i32) {
    %c0_i32 = arith.constant 0 : i32
    %c0_i32_0 = arith.constant 0 : i32
    return %arg1, %c0_i32 : i32, i32
  }
  func.func @transform_2(%arg0: i32, %arg1: i32) -> (i32, i32) {
    %c0_i32 = arith.constant 0 : i32
    %c0_i32_0 = arith.constant 0 : i32
    %c0_i32_1 = arith.constant 0 : i32
    return %c0_i32, %c0_i32_0 : i32, i32
  }
  func.func @transform_3(%arg0: i32, %arg1: i32) -> (i32, i32) {
    %c0_i32 = arith.constant 0 : i32
    %c0_i32_0 = arith.constant 0 : i32
    %c0_i32_1 = arith.constant 0 : i32
    return %c0_i32, %c0_i32_0 : i32, i32
  }
  func.func @transform_4(%arg0: i32, %arg1: i32) -> (i32, i32) {
    %c0_i32 = arith.constant 0 : i32
    %c0_i32_0 = arith.constant 0 : i32
    %c0_i32_1 = arith.constant 0 : i32
    return %c0_i32, %c0_i32_0 : i32, i32
  }
  func.func @transform_5(%arg0: i32, %arg1: i32) -> (i32, i32) {
    %c0_i32 = arith.constant 0 : i32
    %c0_i32_0 = arith.constant 0 : i32
    return %arg0, %c0_i32 : i32, i32
  }
}

module attributes {stable_mosaic.version = 11 : i64} {
  func.func @txt_tower_kernel(%arg0: memref<1x1xf32, #tpu.memory_space<smem>>, %arg1: memref<8x32xbf16, #tpu.memory_space<vmem>>, %arg2: memref<32x64xbf16, #tpu.memory_space<vmem>>, %arg3: memref<1x64xf32, #tpu.memory_space<vmem>>, %arg4: memref<64x32xbf16, #tpu.memory_space<vmem>>, %arg5: memref<8x32xbf16, #tpu.memory_space<vmem>>) attributes {dimension_semantics = [], scalar_prefetch = 0 : i64, scratch_operands = 0 : i64, tpu.core_type = #tpu.core_type<tc>} {
    %c0 = arith.constant 0 : index
    %c0_0 = arith.constant 0 : index
    %0 = vector.load %arg1[%c0, %c0_0] : memref<8x32xbf16, #tpu.memory_space<vmem>>, vector<8x32xbf16>
    %c0_1 = arith.constant 0 : index
    %c0_2 = arith.constant 0 : index
    %1 = vector.load %arg2[%c0_1, %c0_2] : memref<32x64xbf16, #tpu.memory_space<vmem>>, vector<32x64xbf16>
    %cst = arith.constant dense<0.000000e+00> : vector<8x64xf32>
    %2 = tpu.matmul %0, %1, %cst {dimension_numbers = #tpu.dot_dimension_numbers<[1], [0], [0], [1], [0, 0, 1, 1], [], []>} : vector<8x32xbf16>, vector<32x64xbf16>, vector<8x64xf32> -> vector<8x64xf32>
    %c0_3 = arith.constant 0 : index
    %c0_4 = arith.constant 0 : index
    %3 = vector.load %arg3[%c0_3, %c0_4] : memref<1x64xf32, #tpu.memory_space<vmem>>, vector<1x64xf32>
    %4 = vector.broadcast %3 : vector<1x64xf32> to vector<8x64xf32>
    %5 = arith.addf %2, %4 : vector<8x64xf32>
    %6 = arith.truncf %5 : vector<8x64xf32> to vector<8x64xbf16>
    %c0_5 = arith.constant 0 : index
    %c0_6 = arith.constant 0 : index
    %7 = vector.load %arg4[%c0_5, %c0_6] : memref<64x32xbf16, #tpu.memory_space<vmem>>, vector<64x32xbf16>
    %cst_7 = arith.constant dense<0.000000e+00> : vector<8x32xf32>
    %8 = tpu.matmul %6, %7, %cst_7 {dimension_numbers = #tpu.dot_dimension_numbers<[1], [0], [0], [1], [0, 0, 1, 1], [], []>} : vector<8x64xbf16>, vector<64x32xbf16>, vector<8x32xf32> -> vector<8x32xf32>
    %9 = arith.mulf %8, %8 : vector<8x32xf32>
    %cst_8 = arith.constant dense<0.000000e+00> : vector<8xf32>
    %10 = vector.multi_reduction <add>, %9, %cst_8 [1] : vector<8x32xf32> to vector<8xf32>
    %11 = vector.shape_cast %10 : vector<8xf32> to vector<8x1xf32>
    %cst_9 = arith.constant 1.000000e-24 : f32
    %12 = vector.broadcast %cst_9 : f32 to vector<8x1xf32>
    %13 = arith.maximumf %11, %12 : vector<8x1xf32>
    %14 = math.rsqrt %13 : vector<8x1xf32>
    %c0_10 = arith.constant 0 : index
    %c0_11 = arith.constant 0 : index
    %15 = memref.load %arg0[%c0_10, %c0_11] : memref<1x1xf32, #tpu.memory_space<smem>>
    %16 = vector.broadcast %15 : f32 to vector<8x1xf32>
    %17 = arith.mulf %14, %16 : vector<8x1xf32>
    %18 = vector.broadcast %17 : vector<8x1xf32> to vector<8x32xf32>
    %19 = arith.mulf %8, %18 : vector<8x32xf32>
    %20 = arith.truncf %19 : vector<8x32xf32> to vector<8x32xbf16>
    %c0_12 = arith.constant 0 : index
    %c0_13 = arith.constant 0 : index
    %21 = vector.load %arg5[%c0_12, %c0_13] : memref<8x32xbf16, #tpu.memory_space<vmem>>, vector<8x32xbf16>
    tpu.vector_store %arg5[%c0_12, %c0_13], %20 {strides = array<i32>} : memref<8x32xbf16, #tpu.memory_space<vmem>>, vector<8x32xbf16>,
    return
  }
}

module attributes {stable_mosaic.version = 11 : i64} {
  func.func @clip_img_kernel(%arg0: i32, %arg1: i32, %arg2: memref<8x512xbf16, #tpu.memory_space<vmem>>, %arg3: memref<512x64xbf16, #tpu.memory_space<vmem>>, %arg4: memref<1x64xf32, #tpu.memory_space<vmem>>, %arg5: memref<64x32xbf16, #tpu.memory_space<vmem>>, %arg6: memref<32x8xbf16, #tpu.memory_space<vmem>>, %arg7: memref<8x8xf32, #tpu.memory_space<vmem>>, %arg8: memref<8x64xf32, #tpu.memory_space<vmem>>) attributes {dimension_semantics = [#tpu.dimension_semantics<parallel>, #tpu.dimension_semantics<arbitrary>], iteration_bounds = array<i64: 1, 2>, scalar_prefetch = 0 : i64, scratch_operands = 1 : i64, tpu.core_type = #tpu.core_type<tc>, window_params = [{transform_indices = @transform_0, window_bounds = array<i64: 8, 512>}, {transform_indices = @transform_1, window_bounds = array<i64: 512, 64>}, {pipeline_mode = #tpu.pipeline_mode<synchronous>, transform_indices = @transform_2, window_bounds = array<i64: 1, 64>}, {pipeline_mode = #tpu.pipeline_mode<synchronous>, transform_indices = @transform_3, window_bounds = array<i64: 64, 32>}, {pipeline_mode = #tpu.pipeline_mode<synchronous>, transform_indices = @transform_4, window_bounds = array<i64: 32, 8>}, {transform_indices = @transform_5, window_bounds = array<i64: 8, 8>}]} {
    %c0_i32 = arith.constant 0 : i32
    %0 = arith.cmpi eq, %arg1, %c0_i32 : i32
    %1 = arith.extui %0 : i1 to i32
    %c0_i32_0 = arith.constant 0 : i32
    %2 = arith.cmpi ne, %1, %c0_i32_0 : i32
    scf.if %2 {
      %cst_9 = arith.constant 0.000000e+00 : f32
      %12 = vector.broadcast %cst_9 : f32 to vector<8x64xf32>
      %c0_10 = arith.constant 0 : index
      %c0_11 = arith.constant 0 : index
      %13 = vector.load %arg8[%c0_10, %c0_11] : memref<8x64xf32, #tpu.memory_space<vmem>>, vector<8x64xf32>
      tpu.vector_store %arg8[%c0_10, %c0_11], %12 {strides = array<i32>} : memref<8x64xf32, #tpu.memory_space<vmem>>, vector<8x64xf32>,
    } else {
    }
    %c0 = arith.constant 0 : index
    %c0_1 = arith.constant 0 : index
    %3 = vector.load %arg8[%c0, %c0_1] : memref<8x64xf32, #tpu.memory_space<vmem>>, vector<8x64xf32>
    %c0_2 = arith.constant 0 : index
    %c0_3 = arith.constant 0 : index
    %4 = vector.load %arg2[%c0_2, %c0_3] : memref<8x512xbf16, #tpu.memory_space<vmem>>, vector<8x512xbf16>
    %c0_4 = arith.constant 0 : index
    %c0_5 = arith.constant 0 : index
    %5 = vector.load %arg3[%c0_4, %c0_5] : memref<512x64xbf16, #tpu.memory_space<vmem>>, vector<512x64xbf16>
    %cst = arith.constant dense<0.000000e+00> : vector<8x64xf32>
    %6 = tpu.matmul %4, %5, %cst {dimension_numbers = #tpu.dot_dimension_numbers<[1], [0], [0], [1], [0, 0, 1, 1], [], []>} : vector<8x512xbf16>, vector<512x64xbf16>, vector<8x64xf32> -> vector<8x64xf32>
    %7 = arith.addf %3, %6 : vector<8x64xf32>
    %c0_6 = arith.constant 0 : index
    %c0_7 = arith.constant 0 : index
    %8 = vector.load %arg8[%c0_6, %c0_7] : memref<8x64xf32, #tpu.memory_space<vmem>>, vector<8x64xf32>
    tpu.vector_store %arg8[%c0_6, %c0_7], %7 {strides = array<i32>} : memref<8x64xf32, #tpu.memory_space<vmem>>, vector<8x64xf32>,
    %c1_i32 = arith.constant 1 : i32
    %9 = arith.cmpi eq, %arg1, %c1_i32 : i32
    %10 = arith.extui %9 : i1 to i32
    %c0_i32_8 = arith.constant 0 : i32
    %11 = arith.cmpi ne, %10, %c0_i32_8 : i32
    scf.if %11 {
      %c0_9 = arith.constant 0 : index
      %c0_10 = arith.constant 0 : index
      %12 = vector.load %arg8[%c0_9, %c0_10] : memref<8x64xf32, #tpu.memory_space<vmem>>, vector<8x64xf32>
      %c0_11 = arith.constant 0 : index
      %c0_12 = arith.constant 0 : index
      %13 = vector.load %arg4[%c0_11, %c0_12] : memref<1x64xf32, #tpu.memory_space<vmem>>, vector<1x64xf32>
      %14 = vector.broadcast %13 : vector<1x64xf32> to vector<8x64xf32>
      %15 = arith.addf %12, %14 : vector<8x64xf32>
      %16 = arith.truncf %15 : vector<8x64xf32> to vector<8x64xbf16>
      %c0_13 = arith.constant 0 : index
      %c0_14 = arith.constant 0 : index
      %17 = vector.load %arg5[%c0_13, %c0_14] : memref<64x32xbf16, #tpu.memory_space<vmem>>, vector<64x32xbf16>
      %cst_15 = arith.constant dense<0.000000e+00> : vector<8x32xf32>
      %18 = tpu.matmul %16, %17, %cst_15 {dimension_numbers = #tpu.dot_dimension_numbers<[1], [0], [0], [1], [0, 0, 1, 1], [], []>} : vector<8x64xbf16>, vector<64x32xbf16>, vector<8x32xf32> -> vector<8x32xf32>
      %19 = arith.mulf %18, %18 : vector<8x32xf32>
      %cst_16 = arith.constant dense<0.000000e+00> : vector<8xf32>
      %20 = vector.multi_reduction <add>, %19, %cst_16 [1] : vector<8x32xf32> to vector<8xf32>
      %21 = vector.shape_cast %20 : vector<8xf32> to vector<8x1xf32>
      %cst_17 = arith.constant 1.000000e-24 : f32
      %22 = vector.broadcast %cst_17 : f32 to vector<8x1xf32>
      %23 = arith.maximumf %21, %22 : vector<8x1xf32>
      %24 = math.rsqrt %23 : vector<8x1xf32>
      %25 = vector.broadcast %24 : vector<8x1xf32> to vector<8x32xf32>
      %26 = arith.mulf %18, %25 : vector<8x32xf32>
      %27 = arith.truncf %26 : vector<8x32xf32> to vector<8x32xbf16>
      %c0_18 = arith.constant 0 : index
      %c0_19 = arith.constant 0 : index
      %28 = vector.load %arg6[%c0_18, %c0_19] : memref<32x8xbf16, #tpu.memory_space<vmem>>, vector<32x8xbf16>
      %cst_20 = arith.constant dense<0.000000e+00> : vector<8x8xf32>
      %29 = tpu.matmul %27, %28, %cst_20 {dimension_numbers = #tpu.dot_dimension_numbers<[1], [0], [0], [1], [0, 0, 1, 1], [], []>} : vector<8x32xbf16>, vector<32x8xbf16>, vector<8x8xf32> -> vector<8x8xf32>
      %c0_21 = arith.constant 0 : index
      %c0_22 = arith.constant 0 : index
      %30 = vector.load %arg7[%c0_21, %c0_22] : memref<8x8xf32, #tpu.memory_space<vmem>>, vector<8x8xf32>
      tpu.vector_store %arg7[%c0_21, %c0_22], %29 {strides = array<i32>} : memref<8x8xf32, #tpu.memory_space<vmem>>, vector<8x8xf32>,
    } else {
    }
    return
  }
  func.func @transform_0(%arg0: i32, %arg1: i32) -> (i32, i32) {
    %c0_i32 = arith.constant 0 : i32
    return %arg0, %arg1 : i32, i32
  }
  func.func @transform_1(%arg0: i32, %arg1: i32) -> (i32, i32) {
    %c0_i32 = arith.constant 0 : i32
    %c0_i32_0 = arith.constant 0 : i32
    return %arg1, %c0_i32 : i32, i32
  }
  func.func @transform_2(%arg0: i32, %arg1: i32) -> (i32, i32) {
    %c0_i32 = arith.constant 0 : i32
    %c0_i32_0 = arith.constant 0 : i32
    %c0_i32_1 = arith.constant 0 : i32
    return %c0_i32, %c0_i32_0 : i32, i32
  }
  func.func @transform_3(%arg0: i32, %arg1: i32) -> (i32, i32) {
    %c0_i32 = arith.constant 0 : i32
    %c0_i32_0 = arith.constant 0 : i32
    %c0_i32_1 = arith.constant 0 : i32
    return %c0_i32, %c0_i32_0 : i32, i32
  }
  func.func @transform_4(%arg0: i32, %arg1: i32) -> (i32, i32) {
    %c0_i32 = arith.constant 0 : i32
    %c0_i32_0 = arith.constant 0 : i32
    %c0_i32_1 = arith.constant 0 : i32
    return %c0_i32, %c0_i32_0 : i32, i32
  }
  func.func @transform_5(%arg0: i32, %arg1: i32) -> (i32, i32) {
    %c0_i32 = arith.constant 0 : i32
    %c0_i32_0 = arith.constant 0 : i32
    return %arg0, %c0_i32 : i32, i32
  }
}

</mosaic_0001>

<bundles_post_ra>
// kernel: clip_forward.2
= control target key start
LH: loop header
LB: loop body
LE: loop exit
PB: predicated region body
PF: predicated region fallthrough
CT: control target
= control target key end

     0   :  { %v231_v0 = vmov 0.0   ;;  %vm232_vm0 = vmmov 0   ;;  %vm46_vm1 = vcmask 261120   ;;  %vm123_vm2 = vcmask 523264   ;;  %s295_s2 = inlined_call_operand.vmem [shape: bf16[32,64], index: 2, kind: input, shape index: {}]   ;;  %s296_s4 = inlined_call_operand.vmem [shape: bf16[64,32], index: 4, kind: input, shape index: {}]   ;;  %s297_s1 = inlined_call_operand.vmem [shape: bf16[8,32], index: 1, kind: input, shape index: {}]   ;;  %s298_s3 = inlined_call_operand.vmem [shape: f32[1,64], index: 3, kind: input, shape index: {}]   ;;  %s299_s0 = inlined_call_operand.<no memory space> [shape: f32[1,1], index: 0, kind: input, shape index: {}]   ;;  %s300_s5 = inlined_call_operand.vmem [shape: bf16[8,32], index: 5, kind: output, shape index: {}]  }
   0x1   :  { %201 = vmatprep.subr.bf16.mxu0 %v231_v0  ;;  %v223_v1 = vld [vmem:[%s295_s2] sm:$0xff]   ;;  %205 = vmatprep.mubr.msk.bf16.mxu0 %vm232_vm0, %v231_v0  ;;  %v224_v2 = vld [vmem:[%s295_s2 + $0x8] sm:$0xff]   ;;  %v227_v6 = vld [vmem:[%s296_s4 + $0x10] sm:$0xff]   ;;  %v174_v23 = vstv %s299_s0  ;;  %vm178_vm3 = vcmask 257024  }
   0x2   :  { %209 = vmatprep.subr.bf16.mxu1 %v231_v0  ;;  %217 = vmatprep.mubr.msk.bf16.mxu1 %vm232_vm0, %v231_v0  ;;  %v225_v3 = vld [vmem:[%s296_s4] sm:$0xff]   ;;  %v226_v4 = vld [vmem:[%s296_s4 + $0x8] sm:$0xff]   ;;  %v228_v7 = vld [vmem:[%s296_s4 + $0x18] sm:$0xff]  }
   0x3   :  { %202 = vmatpush3.bf16.msra.mxu0 %v223_v1  ;;  %210 = vmatpush3.bf16.msra.mxu1 %v225_v3  ;;  %v22_v5 = vld [vmem:[%s297_s1] sm:$0xf] }
   0x4   :  { %203 = vmatprep.subr.bf16.mxu0 %v231_v0  ;;  %211 = vmatprep.subr.bf16.mxu1 %v231_v0  ;;  %v184_v8 = vld [vmem:[%s298_s3] ss:$0 sm:$0xff] }
   0x7   :  { %204 = vmatpush3.bf16.msra.mxu0 %v224_v2  ;;  %212 = vmatpush3.bf16.msra.mxu1 %v226_v4 }
   0x8   :  { %213 = vmatprep.subr.bf16.mxu1 %v231_v0 }
   0xa   :  { %206 = vmatmul.mubr.msk.bf16.vlgmr.msra.gmra.mrb[0].mxu0 %vm46_vm1, %v22_v5 }
   0xb   :  { %214 = vmatpush3.bf16.msra.mxu1 %v227_v6 }
   0xc   :  { %215 = vmatprep.subr.bf16.mxu1 %v231_v0 }
   0xf   :  { %216 = vmatpush3.bf16.msra.mxu1 %v228_v7 }
  0xdd   :  { %v84_v9 = vpop.f32.mrb[0].mxu0 }
  0xde   :  { %v85_v10 = vadd.f32 %v184_v8, %v84_v9  ;;  %v207_v11 = vpop.f32.mrb[1].mxu0 }
  0xdf   :  { %v87_v12 = vpop.f32.mrb[2].mxu0 }
  0xe0   :  { %v90_v13 = vpack.c.bf16 %v85_v10, %v85_v10  ;;  %v208_v14 = vpop.f32.mrb[3].mxu0 }
  0xe2   :  { %218 = vmatmul.mubr.msk.bf16.vlgmr.msra.gmra.mrb[0].mxu1 %vm123_vm2, %v90_v13 }
 0x1b5   :  { %v161_v15 = vpop.f32.mrb[0].mxu1 }
 0x1b6   :  { %v219_v16 = vpop.f32.mrb[1].mxu1  ;;  %v167_v17 = vmul.f32 %v161_v15, %v161_v15 }
 0x1b7   :  { %v164_v18 = vpop.f32.mrb[2].mxu1 }
 0x1b8   :  { %v220_v19 = vpop.f32.mrb[3].mxu1  ;;  %v168_v20 = vsel %vm46_vm1, %v167_v17, 0.0 }
 0x1b9   :  { %169 = vadd.xlane.f32.xlu0 %v168_v20 }
 0x246   :  { %v170_v21 = vpop.xlane.xlu0 %169 }
 0x247   :  { %v171_v22 = vmax.f32 %v170_v21, 1e-24 }
 0x249   :  { %229 = vrsqrt.f32 %v171_v22 }
 0x253   :  { %v230_v24 = vpop.eup %229 }
 0x254   :  { %v175_v25 = vmul.f32 %v230_v24, %v174_v23 }
 0x256   :  { %v176_v26 = vmul.f32 %v175_v25, %v161_v15 }
 0x258   :  { %v177_v27 = vpack.c.bf16 %v176_v26, %v176_v26 }
 0x25a   :  { %179 = vst.msk [vmem:[%s300_s5] sm:$0xf] %vm178_vm3, %v177_v27 }

// kernel: clip_forward.3
= control target key start
LH: loop header
LB: loop body
LE: loop exit
PB: predicated region body
PF: predicated region fallthrough
CT: control target
= control target key end

     0   :  { %s1130_s18 = smov 0   ;;  %s1132_s19 = smov 0   ;;  %s1235_s0 = inlined_call_operand.vmem [shape: bf16[8,1024], index: 0, kind: input, shape index: {}]   ;;  %s1236_s1 = inlined_call_operand.vmem [shape: bf16[1024,64], index: 1, kind: input, shape index: {}]   ;;  %s1237_s2 = inlined_call_operand.vmem [shape: f32[1,64], index: 2, kind: input, shape index: {}]   ;;  %s1238_s3 = inlined_call_operand.vmem [shape: bf16[64,32], index: 3, kind: input, shape index: {}]   ;;  %s1239_s4 = inlined_call_operand.vmem [shape: bf16[32,8], index: 4, kind: input, shape index: {}]   ;;  %s1240_s5 = inlined_call_operand.vmem [shape: f32[8,8], index: 5, kind: output, shape index: {}]  }
   0x1   :  { %s1134_s20 = smov 0  }
   0x2 LB: > { %s24_s21 = sadd.s32 1, %s1091_s19  ;;  %p875_p0 = scmp.ge.s32.totalorder %s1095_s20, 1  ;;  %s1095_s20 = sphi %s1134_s20, %s15_s20   ;;  %s1091_s19 = sphi %s1132_s19, %s1242_s19   ;;  %s1087_s18 = sphi %s1130_s18, %s1241_s18  }
   0x3   : > { %p25_p1 = scmp.ge.s32.totalorder %s24_s21, 2  ;;  %p217_p2 = scmp.lt.s32.totalorder %s1095_s20, 3 }
   0x5   : > { %s1244_s21 = smov (%p25_p1, %s24_s21), 0  ;;  %p218_p3 = pnand %p875_p0, %p217_p2 }
   0x6   : > { %s876_s22 = sshll.u32 (!%p218_p3), %s1087_s18, 2  ;;  %s878_s23 = sshll.u32 (!%p218_p3), %s1087_s18, 6 }
   0x7   : > { %221 = sbr.rel (%p218_p3) target bundleno = 879 (0x36f), region = 40  ;;  %p256_p4 = scmp.lt.s32.totalorder (!%p218_p3), %s876_s22, 7 }
   0x8   : > { %p264_p5 = scmp.lt.s32.totalorder (!%p218_p3), %s878_s23, 127  ;;  %p880_p6 = scmp.ne.s32.totalorder (!%p218_p3), %s1087_s18, 0 }
   0xe   : > { %s1246_s22 = smov (!%p256_p4, %s876_s22), 7  ;;  %s1248_s23 = smov (!%p264_p5, %s878_s23), 127 }
   0xf   : > { %s877_s24 = sshll.u32 %s1246_s22, 2  ;;  %s879_s28 = sshll.u32 %s1248_s23, 2  ;;  %vm278_vm0 = vcmask (!%p880_p6), 523264   ;;  %v1097_v0 = vmov (!%p880_p6), 0.0  }
  0x10   : > { %s1155_s27 = scalar_lea.vmem %s1235_s0, %s877_s24  ;;  %s1160_s6 = scalar_lea.vmem %s1236_s1, %s879_s28  ;;  %279 = vst.msk [vmem:[#allocation2] sm:$0xff] (!%p880_p6), %vm278_vm0, %v1097_v0 }
  0x11   : > { %277 = sbr.rel (%p880_p6) target bundleno = 24 (0x18), region = 44 }
  0x18 PF: > { %v1029_v1 = vld [vmem:[%s1160_s6 + $0x40] sm:$0xff]   ;;  %v1033_v5 = vld [vmem:[%s1160_s6 + $0x48] sm:$0xff]   ;;  %v1037_v9 = vld [vmem:[%s1160_s6 + $0x50] sm:$0xff]   ;;  %vm634_vm1 = vcmask 523264   ;;  %p917_p7 = scmp.ne.s32.totalorder %s1087_s18, 1 }
  0x19   : > { %v1030_v2 = vld [vmem:[%s1160_s6 + $0xc0] sm:$0xff]   ;;  %930 = vmatprep.subr.bf16.mxu0 %v1029_v1  ;;  %v1034_v6 = vld [vmem:[%s1160_s6 + $0xc8] sm:$0xff]   ;;  %v1038_v10 = vld [vmem:[%s1160_s6 + $0xd0] sm:$0xff]   ;;  %v1098_v53 = vmov (!%p917_p7), 0.0   ;;  %vm1099_vm2 = vmmov (!%p917_p7), 0   ;;  %vm726_vm3 = vcmask (!%p917_p7), 261120  }
  0x1a   : > { %v1031_v3 = vld [vmem:[%s1160_s6] sm:$0xff]   ;;  %952 = vmatprep.subr.bf16.mxu1 %v1030_v2  ;;  %v1035_v7 = vld [vmem:[%s1160_s6 + $0x8] sm:$0xff]   ;;  %v1039_v11 = vld [vmem:[%s1160_s6 + $0x10] sm:$0xff]   ;;  %vm793_vm4 = vcmask (!%p917_p7), 64512  }
  0x1b   : > { %v1032_v4 = vld [vmem:[%s1160_s6 + $0x80] sm:$0xff]   ;;  %931 = vmatpush3.bf16.msra.mxu0 %v1031_v3  ;;  %v1036_v8 = vld [vmem:[%s1160_s6 + $0x88] sm:$0xff]   ;;  %v1040_v12 = vld [vmem:[%s1160_s6 + $0x90] sm:$0xff]  }
  0x1c   : > { %953 = vmatpush3.bf16.msra.mxu1 %v1032_v4  ;;  %932 = vmatprep.subr.bf16.mxu0 %v1033_v5  ;;  %v1041_v13 = vld [vmem:[%s1160_s6 + $0x58] sm:$0xff]   ;;  %v1045_v17 = vld [vmem:[%s1160_s6 + $0x60] sm:$0xff]   ;;  %v1049_v21 = vld [vmem:[%s1160_s6 + $0x68] sm:$0xff]  }
  0x1d   : > { %954 = vmatprep.subr.bf16.mxu1 %v1034_v6  ;;  %v1042_v14 = vld [vmem:[%s1160_s6 + $0xd8] sm:$0xff]   ;;  %v1046_v18 = vld [vmem:[%s1160_s6 + $0xe0] sm:$0xff]   ;;  %v1050_v22 = vld [vmem:[%s1160_s6 + $0xe8] sm:$0xff]  }
  0x1e   : > { %v1043_v15 = vld [vmem:[%s1160_s6 + $0x18] sm:$0xff]   ;;  %v1047_v19 = vld [vmem:[%s1160_s6 + $0x20] sm:$0xff]   ;;  %v1051_v23 = vld [vmem:[%s1160_s6 + $0x28] sm:$0xff]  }
  0x1f   : > { %933 = vmatpush3.bf16.msra.mxu0 %v1035_v7  ;;  %v1044_v16 = vld [vmem:[%s1160_s6 + $0x98] sm:$0xff]   ;;  %v1048_v20 = vld [vmem:[%s1160_s6 + $0xa0] sm:$0xff]   ;;  %v1052_v24 = vld [vmem:[%s1160_s6 + $0xa8] sm:$0xff]  }
  0x20   : > { %955 = vmatpush3.bf16.msra.mxu1 %v1036_v8  ;;  %934 = vmatprep.subr.bf16.mxu0 %v1037_v9  ;;  %v1053_v25 = vld [vmem:[%s1160_s6 + $0x70] sm:$0xff]   ;;  %v1057_v29 = vld [vmem:[%s1160_s6 + $0x78] sm:$0xff]   ;;  %v281_v33 = vld [vmem:[%s1155_s27] sm:$0xff] }
  0x21   : > { %956 = vmatprep.subr.bf16.mxu1 %v1038_v10  ;;  %v1054_v26 = vld [vmem:[%s1160_s6 + $0xf0] sm:$0xff]   ;;  %v1058_v30 = vld [vmem:[%s1160_s6 + $0xf8] sm:$0xff]   ;;  %v282_v34 = vld [vmem:[%s1155_s27 + $0x8] sm:$0xff]  ;;  %v881_v35 = vcombine.low %v281_v33, %v281_v33  ;;  %v882_v36 = vcombine.high %v281_v33, %v281_v33 }
  0x22   : > { %v1055_v27 = vld [vmem:[%s1160_s6 + $0x30] sm:$0xff]   ;;  %v1059_v31 = vld [vmem:[%s1160_s6 + $0x38] sm:$0xff]   ;;  %v883_v37 = vcombine.low %v282_v34, %v282_v34  ;;  %v884_v38 = vcombine.high %v282_v34, %v282_v34  ;;  %v280_v47 = vld [vmem:[#allocation2] sm:$0xff] }
  0x23   : > { %935 = vmatpush3.bf16.msra.mxu0 %v1039_v11  ;;  %v1056_v28 = vld [vmem:[%s1160_s6 + $0xb0] sm:$0xff]   ;;  %v1060_v32 = vld [vmem:[%s1160_s6 + $0xb8] sm:$0xff]   ;;  %585 = vmatprep.mubr.bf16.mxu0 %v882_v36  ;;  %v1065_v52 = vld [vmem:[%s1238_s3] sm:$0xff] (!%p917_p7)  }
  0x24   : > { %957 = vmatpush3.bf16.msra.mxu1 %v1040_v12  ;;  %936 = vmatprep.subr.bf16.mxu0 %v1041_v13  ;;  %v1066_v54 = vld [vmem:[%s1238_s3 + $0x8] sm:$0xff] (!%p917_p7)   ;;  %v1067_v55 = vld [vmem:[%s1238_s3 + $0x10] sm:$0xff] (!%p917_p7)   ;;  %v918_v57 = vld [vmem:[%s1237_s2] ss:$0 sm:$0xff] (!%p917_p7) }
  0x25   : > { %958 = vmatprep.subr.bf16.mxu1 %v1042_v14  ;;  %625 = vmatprep.mubr.bf16.mxu1 %v884_v38  ;;  %v1068_v59 = vld [vmem:[%s1238_s3 + $0x18] sm:$0xff] (!%p917_p7)   ;;  %v1069_v3 = vld [vmem:[%s1239_s4] sm:$0xff] (!%p917_p7)   ;;  %v1070_v4 = vld [vmem:[%s1239_s4 + $0x8] sm:$0xff] (!%p917_p7)  }
  0x27   : > { %937 = vmatpush3.bf16.msra.mxu0 %v1043_v15 }
  0x28   : > { %959 = vmatpush3.bf16.msra.mxu1 %v1044_v16  ;;  %938 = vmatprep.subr.bf16.mxu0 %v1045_v17 }
  0x29   : > { %960 = vmatprep.subr.bf16.mxu1 %v1046_v18 }
  0x2b   : > { %939 = vmatpush3.bf16.msra.mxu0 %v1047_v19 }
  0x2c   : > { %961 = vmatpush3.bf16.msra.mxu1 %v1048_v20  ;;  %940 = vmatprep.subr.bf16.mxu0 %v1049_v21 }
  0x2d   : > { %962 = vmatprep.subr.bf16.mxu1 %v1050_v22 }
  0x2f   : > { %941 = vmatpush3.bf16.msra.mxu0 %v1051_v23 }
  0x30   : > { %963 = vmatpush3.bf16.msra.mxu1 %v1052_v24  ;;  %942 = vmatprep.subr.bf16.mxu0 %v1053_v25 }
  0x31   : > { %964 = vmatprep.subr.bf16.mxu1 %v1054_v26 }
  0x33   : > { %943 = vmatpush3.bf16.msra.mxu0 %v1055_v27 }
  0x34   : > { %965 = vmatpush3.bf16.msra.mxu1 %v1056_v28  ;;  %944 = vmatprep.subr.bf16.mxu0 %v1057_v29 }
  0x35   : > { %966 = vmatprep.subr.bf16.mxu1 %v1058_v30 }
  0x37   : > { %945 = vmatpush3.bf16.msra.mxu0 %v1059_v31 }
  0x38   : > { %967 = vmatpush3.bf16.msra.mxu1 %v1060_v32  ;;  %982 = vmatprep.subr.bf16.mxu0 (!%p917_p7), %v1098_v53 }
  0x39   : > { %994 = vmatprep.subr.bf16.mxu1 (!%p917_p7), %v1098_v53 }
  0x3a   : > { %586 = vmatmul.mubr.bf16.vlgmr.msra.gmra.mrb[0].mxu0 %v881_v35 }
  0x3b   : > { %626 = vmatmul.mubr.bf16.vlgmr.msra.gmra.mrb[0].mxu1 %v883_v37  ;;  %983 = vmatpush3.bf16.msra.mxu0 (!%p917_p7), %v1065_v52 }
  0x3c   : > { %990 = vmatprep.mubr.msk.bf16.mxu0 (!%p917_p7), %vm1099_vm2, %v1098_v53  ;;  %984 = vmatprep.subr.bf16.mxu0 (!%p917_p7), %v1098_v53 }
  0x3d   : > { %998 = vmatprep.mubr.msk.bf16.mxu1 (!%p917_p7), %vm1099_vm2, %v1098_v53  ;;  %995 = vmatpush3.bf16.msra.mxu1 (!%p917_p7), %v1069_v3 }
  0x3e   : > { %996 = vmatprep.subr.bf16.mxu1 (!%p917_p7), %v1098_v53 }
  0x3f   : > { %985 = vmatpush3.bf16.msra.mxu0 (!%p917_p7), %v1066_v54 }
  0x40   : > { %986 = vmatprep.subr.bf16.mxu0 (!%p917_p7), %v1098_v53 }
  0x41   : > { %997 = vmatpush3.bf16.msra.mxu1 (!%p917_p7), %v1070_v4 }
  0x43   : > { %987 = vmatpush3.bf16.msra.mxu0 (!%p917_p7), %v1067_v55 }
  0x44   : > { %988 = vmatprep.subr.bf16.mxu0 (!%p917_p7), %v1098_v53 }
  0x47   : > { %989 = vmatpush3.bf16.msra.mxu0 (!%p917_p7), %v1068_v59 }
 0x10d   : > { %v946_v39 = vpop.f32.mrb[0].mxu0 }
 0x10e   : > { %v968_v40 = vpop.f32.mrb[0].mxu1  ;;  %v947_v41 = vpop.f32.mrb[1].mxu0 }
 0x10f   : > { %v969_v42 = vpop.f32.mrb[1].mxu1  ;;  %v948_v43 = vadd.f32 %v947_v41, %v946_v39  ;;  %v949_v45 = vpop.f32.mrb[2].mxu0 }
 0x110   : > { %v970_v44 = vadd.f32 %v969_v42, %v968_v40  ;;  %v971_v46 = vpop.f32.mrb[2].mxu1  ;;  %v950_v48 = vpop.f32.mrb[3].mxu0  ;;  %639 = sbr.rel (%p917_p7) target bundleno = 879 (0x36f), region = 48 }
 0x111   : > { %v972_v49 = vpop.f32.mrb[3].mxu1 }
 0x112   : > { %v628_v50 = vadd.f32 %v970_v44, %v948_v43 }
 0x114   : > { %v633_v51 = vadd.f32 %v628_v50, %v280_v47 }
 0x116   : > { %635 = vst.msk [vmem:[#allocation2] sm:$0xff] %vm634_vm1, %v633_v51 }
 0x11d   : > { %v640_v56 = vld [vmem:[#allocation2] sm:$0xff] }
 0x11e   : > { %v648_v58 = vadd.f32 %v918_v57, %v640_v56 }
 0x120   : > { %v649_v60 = vpack.c.bf16 %v648_v58, %v648_v58 }
 0x122   : > { %991 = vmatmul.mubr.msk.bf16.vlgmr.msra.gmra.mrb[0].mxu0 %vm634_vm1, %v649_v60 }
 0x1f5   : > { %v719_v61 = vpop.f32.mrb[0].mxu0 }
 0x1f6   : > { %v992_v62 = vpop.f32.mrb[1].mxu0  ;;  %v725_v63 = vmul.f32 %v719_v61, %v719_v61 }
 0x1f7   : > { %v722_v0 = vpop.f32.mrb[2].mxu0 }
 0x1f8   : > { %v993_v1 = vpop.f32.mrb[3].mxu0  ;;  %v727_v2 = vsel %vm726_vm3, %v725_v63, 0.0 }
 0x1f9   : > { %728 = vadd.xlane.f32.xlu0 %v727_v2 }
 0x286   : > { %v729_v5 = vpop.xlane.xlu0 %728 }
 0x287   : > { %v730_v6 = vmax.f32 %v729_v5, 1e-24 }
 0x289   : > { %1071 = vrsqrt.f32 %v730_v6 }
 0x293   : > { %v1072_v7 = vpop.eup %1071 }
 0x294   : > { %v732_v8 = vmul.f32 %v1072_v7, %v719_v61 }
 0x296   : > { %v733_v9 = vpack.c.bf16 %v732_v8, %v732_v8 }
 0x298   : > { %999 = vmatmul.mubr.msk.bf16.vlgmr.msra.gmra.mrb[0].mxu1 %vm726_vm3, %v733_v9 }
 0x36b   : > { %v787_v10 = vpop.f32.mrb[0].mxu1 }
 0x36c   : > { %794 = vst.msk [vmem:[%s1240_s5] sm:$0xff] %vm793_vm4, %v787_v10  ;;  %v1000_v11 = vpop.f32.mrb[1].mxu1 }
 0x36d   : > { %v790_v12 = vpop.f32.mrb[2].mxu1 }
 0x36e   : > { %v1001_v13 = vpop.f32.mrb[3].mxu1 }
 0x36f PF: > { %s15_s20 = sadd.s32 1, %s1095_s20   ;;  %s1241_s18 = smov %s1091_s19 }
 0x370   : > { %p12_p8 = scmp.ge.s32.totalorder %s15_s20, 4   ;;  %s1242_s19 = smov %s1244_s21 }
 0x372   :  { %14 = sbr.rel (!%p12_p8) target bundleno = 2 (0x2), region = 81 }

// kernel: clip_forward.2
= control target key start
LH: loop header
LB: loop body
LE: loop exit
PB: predicated region body
PF: predicated region fallthrough
CT: control target
= control target key end

     0   :  { %v231_v0 = vmov 0.0   ;;  %vm232_vm0 = vmmov 0   ;;  %vm46_vm1 = vcmask 261120   ;;  %vm123_vm2 = vcmask 523264   ;;  %s295_s2 = inlined_call_operand.vmem [shape: bf16[32,64], index: 2, kind: input, shape index: {}]   ;;  %s296_s4 = inlined_call_operand.vmem [shape: bf16[64,32], index: 4, kind: input, shape index: {}]   ;;  %s297_s1 = inlined_call_operand.vmem [shape: bf16[8,32], index: 1, kind: input, shape index: {}]   ;;  %s298_s3 = inlined_call_operand.vmem [shape: f32[1,64], index: 3, kind: input, shape index: {}]   ;;  %s299_s0 = inlined_call_operand.<no memory space> [shape: f32[1,1], index: 0, kind: input, shape index: {}]   ;;  %s300_s5 = inlined_call_operand.vmem [shape: bf16[8,32], index: 5, kind: output, shape index: {}]  }
   0x1   :  { %201 = vmatprep.subr.bf16.mxu0 %v231_v0  ;;  %v223_v1 = vld [vmem:[%s295_s2] sm:$0xff]   ;;  %205 = vmatprep.mubr.msk.bf16.mxu0 %vm232_vm0, %v231_v0  ;;  %v224_v2 = vld [vmem:[%s295_s2 + $0x8] sm:$0xff]   ;;  %v227_v6 = vld [vmem:[%s296_s4 + $0x10] sm:$0xff]   ;;  %v174_v23 = vstv %s299_s0  ;;  %vm178_vm3 = vcmask 257024  }
   0x2   :  { %209 = vmatprep.subr.bf16.mxu1 %v231_v0  ;;  %217 = vmatprep.mubr.msk.bf16.mxu1 %vm232_vm0, %v231_v0  ;;  %v225_v3 = vld [vmem:[%s296_s4] sm:$0xff]   ;;  %v226_v4 = vld [vmem:[%s296_s4 + $0x8] sm:$0xff]   ;;  %v228_v7 = vld [vmem:[%s296_s4 + $0x18] sm:$0xff]  }
   0x3   :  { %202 = vmatpush3.bf16.msra.mxu0 %v223_v1  ;;  %210 = vmatpush3.bf16.msra.mxu1 %v225_v3  ;;  %v22_v5 = vld [vmem:[%s297_s1] sm:$0xf] }
   0x4   :  { %203 = vmatprep.subr.bf16.mxu0 %v231_v0  ;;  %211 = vmatprep.subr.bf16.mxu1 %v231_v0  ;;  %v184_v8 = vld [vmem:[%s298_s3] ss:$0 sm:$0xff] }
   0x7   :  { %204 = vmatpush3.bf16.msra.mxu0 %v224_v2  ;;  %212 = vmatpush3.bf16.msra.mxu1 %v226_v4 }
   0x8   :  { %213 = vmatprep.subr.bf16.mxu1 %v231_v0 }
   0xa   :  { %206 = vmatmul.mubr.msk.bf16.vlgmr.msra.gmra.mrb[0].mxu0 %vm46_vm1, %v22_v5 }
   0xb   :  { %214 = vmatpush3.bf16.msra.mxu1 %v227_v6 }
   0xc   :  { %215 = vmatprep.subr.bf16.mxu1 %v231_v0 }
   0xf   :  { %216 = vmatpush3.bf16.msra.mxu1 %v228_v7 }
  0xdd   :  { %v84_v9 = vpop.f32.mrb[0].mxu0 }
  0xde   :  { %v85_v10 = vadd.f32 %v184_v8, %v84_v9  ;;  %v207_v11 = vpop.f32.mrb[1].mxu0 }
  0xdf   :  { %v87_v12 = vpop.f32.mrb[2].mxu0 }
  0xe0   :  { %v90_v13 = vpack.c.bf16 %v85_v10, %v85_v10  ;;  %v208_v14 = vpop.f32.mrb[3].mxu0 }
  0xe2   :  { %218 = vmatmul.mubr.msk.bf16.vlgmr.msra.gmra.mrb[0].mxu1 %vm123_vm2, %v90_v13 }
 0x1b5   :  { %v161_v15 = vpop.f32.mrb[0].mxu1 }
 0x1b6   :  { %v219_v16 = vpop.f32.mrb[1].mxu1  ;;  %v167_v17 = vmul.f32 %v161_v15, %v161_v15 }
 0x1b7   :  { %v164_v18 = vpop.f32.mrb[2].mxu1 }
 0x1b8   :  { %v220_v19 = vpop.f32.mrb[3].mxu1  ;;  %v168_v20 = vsel %vm46_vm1, %v167_v17, 0.0 }
 0x1b9   :  { %169 = vadd.xlane.f32.xlu0 %v168_v20 }
 0x246   :  { %v170_v21 = vpop.xlane.xlu0 %169 }
 0x247   :  { %v171_v22 = vmax.f32 %v170_v21, 1e-24 }
 0x249   :  { %229 = vrsqrt.f32 %v171_v22 }
 0x253   :  { %v230_v24 = vpop.eup %229 }
 0x254   :  { %v175_v25 = vmul.f32 %v230_v24, %v174_v23 }
 0x256   :  { %v176_v26 = vmul.f32 %v175_v25, %v161_v15 }
 0x258   :  { %v177_v27 = vpack.c.bf16 %v176_v26, %v176_v26 }
 0x25a   :  { %179 = vst.msk [vmem:[%s300_s5] sm:$0xf] %vm178_vm3, %v177_v27 }

// kernel: clip_forward.3
= control target key start
LH: loop header
LB: loop body
LE: loop exit
PB: predicated region body
PF: predicated region fallthrough
CT: control target
= control target key end

     0   :  { %s1130_s18 = smov 0   ;;  %s1132_s19 = smov 0   ;;  %s1235_s0 = inlined_call_operand.vmem [shape: bf16[8,1024], index: 0, kind: input, shape index: {}]   ;;  %s1236_s1 = inlined_call_operand.vmem [shape: bf16[1024,64], index: 1, kind: input, shape index: {}]   ;;  %s1237_s2 = inlined_call_operand.vmem [shape: f32[1,64], index: 2, kind: input, shape index: {}]   ;;  %s1238_s3 = inlined_call_operand.vmem [shape: bf16[64,32], index: 3, kind: input, shape index: {}]   ;;  %s1239_s4 = inlined_call_operand.vmem [shape: bf16[32,8], index: 4, kind: input, shape index: {}]   ;;  %s1240_s5 = inlined_call_operand.vmem [shape: f32[8,8], index: 5, kind: output, shape index: {}]  }
   0x1   :  { %s1134_s20 = smov 0  }
   0x2 LB: > { %s24_s21 = sadd.s32 1, %s1091_s19  ;;  %p875_p0 = scmp.ge.s32.totalorder %s1095_s20, 1  ;;  %s1095_s20 = sphi %s1134_s20, %s15_s20   ;;  %s1091_s19 = sphi %s1132_s19, %s1242_s19   ;;  %s1087_s18 = sphi %s1130_s18, %s1241_s18  }
   0x3   : > { %p25_p1 = scmp.ge.s32.totalorder %s24_s21, 2  ;;  %p217_p2 = scmp.lt.s32.totalorder %s1095_s20, 3 }
   0x5   : > { %s1244_s21 = smov (%p25_p1, %s24_s21), 0  ;;  %p218_p3 = pnand %p875_p0, %p217_p2 }
   0x6   : > { %s876_s22 = sshll.u32 (!%p218_p3), %s1087_s18, 2  ;;  %s878_s23 = sshll.u32 (!%p218_p3), %s1087_s18, 6 }
   0x7   : > { %221 = sbr.rel (%p218_p3) target bundleno = 879 (0x36f), region = 40  ;;  %p256_p4 = scmp.lt.s32.totalorder (!%p218_p3), %s876_s22, 7 }
   0x8   : > { %p264_p5 = scmp.lt.s32.totalorder (!%p218_p3), %s878_s23, 127  ;;  %p880_p6 = scmp.ne.s32.totalorder (!%p218_p3), %s1087_s18, 0 }
   0xe   : > { %s1246_s22 = smov (!%p256_p4, %s876_s22), 7  ;;  %s1248_s23 = smov (!%p264_p5, %s878_s23), 127 }
   0xf   : > { %s877_s24 = sshll.u32 %s1246_s22, 2  ;;  %s879_s28 = sshll.u32 %s1248_s23, 2  ;;  %vm278_vm0 = vcmask (!%p880_p6), 523264   ;;  %v1097_v0 = vmov (!%p880_p6), 0.0  }
  0x10   : > { %s1155_s27 = scalar_lea.vmem %s1235_s0, %s877_s24  ;;  %s1160_s6 = scalar_lea.vmem %s1236_s1, %s879_s28  ;;  %279 = vst.msk [vmem:[#allocation2] sm:$0xff] (!%p880_p6), %vm278_vm0, %v1097_v0 }
  0x11   : > { %277 = sbr.rel (%p880_p6) target bundleno = 24 (0x18), region = 44 }
  0x18 PF: > { %v1029_v1 = vld [vmem:[%s1160_s6 + $0x40] sm:$0xff]   ;;  %v1033_v5 = vld [vmem:[%s1160_s6 + $0x48] sm:$0xff]   ;;  %v1037_v9 = vld [vmem:[%s1160_s6 + $0x50] sm:$0xff]   ;;  %vm634_vm1 = vcmask 523264   ;;  %p917_p7 = scmp.ne.s32.totalorder %s1087_s18, 1 }
  0x19   : > { %v1030_v2 = vld [vmem:[%s1160_s6 + $0xc0] sm:$0xff]   ;;  %930 = vmatprep.subr.bf16.mxu0 %v1029_v1  ;;  %v1034_v6 = vld [vmem:[%s1160_s6 + $0xc8] sm:$0xff]   ;;  %v1038_v10 = vld [vmem:[%s1160_s6 + $0xd0] sm:$0xff]   ;;  %v1098_v53 = vmov (!%p917_p7), 0.0   ;;  %vm1099_vm2 = vmmov (!%p917_p7), 0   ;;  %vm726_vm3 = vcmask (!%p917_p7), 261120  }
  0x1a   : > { %v1031_v3 = vld [vmem:[%s1160_s6] sm:$0xff]   ;;  %952 = vmatprep.subr.bf16.mxu1 %v1030_v2  ;;  %v1035_v7 = vld [vmem:[%s1160_s6 + $0x8] sm:$0xff]   ;;  %v1039_v11 = vld [vmem:[%s1160_s6 + $0x10] sm:$0xff]   ;;  %vm793_vm4 = vcmask (!%p917_p7), 64512  }
  0x1b   : > { %v1032_v4 = vld [vmem:[%s1160_s6 + $0x80] sm:$0xff]   ;;  %931 = vmatpush3.bf16.msra.mxu0 %v1031_v3  ;;  %v1036_v8 = vld [vmem:[%s1160_s6 + $0x88] sm:$0xff]   ;;  %v1040_v12 = vld [vmem:[%s1160_s6 + $0x90] sm:$0xff]  }
  0x1c   : > { %953 = vmatpush3.bf16.msra.mxu1 %v1032_v4  ;;  %932 = vmatprep.subr.bf16.mxu0 %v1033_v5  ;;  %v1041_v13 = vld [vmem:[%s1160_s6 + $0x58] sm:$0xff]   ;;  %v1045_v17 = vld [vmem:[%s1160_s6 + $0x60] sm:$0xff]   ;;  %v1049_v21 = vld [vmem:[%s1160_s6 + $0x68] sm:$0xff]  }
  0x1d   : > { %954 = vmatprep.subr.bf16.mxu1 %v1034_v6  ;;  %v1042_v14 = vld [vmem:[%s1160_s6 + $0xd8] sm:$0xff]   ;;  %v1046_v18 = vld [vmem:[%s1160_s6 + $0xe0] sm:$0xff]   ;;  %v1050_v22 = vld [vmem:[%s1160_s6 + $0xe8] sm:$0xff]  }
  0x1e   : > { %v1043_v15 = vld [vmem:[%s1160_s6 + $0x18] sm:$0xff]   ;;  %v1047_v19 = vld [vmem:[%s1160_s6 + $0x20] sm:$0xff]   ;;  %v1051_v23 = vld [vmem:[%s1160_s6 + $0x28] sm:$0xff]  }
  0x1f   : > { %933 = vmatpush3.bf16.msra.mxu0 %v1035_v7  ;;  %v1044_v16 = vld [vmem:[%s1160_s6 + $0x98] sm:$0xff]   ;;  %v1048_v20 = vld [vmem:[%s1160_s6 + $0xa0] sm:$0xff]   ;;  %v1052_v24 = vld [vmem:[%s1160_s6 + $0xa8] sm:$0xff]  }
  0x20   : > { %955 = vmatpush3.bf16.msra.mxu1 %v1036_v8  ;;  %934 = vmatprep.subr.bf16.mxu0 %v1037_v9  ;;  %v1053_v25 = vld [vmem:[%s1160_s6 + $0x70] sm:$0xff]   ;;  %v1057_v29 = vld [vmem:[%s1160_s6 + $0x78] sm:$0xff]   ;;  %v281_v33 = vld [vmem:[%s1155_s27] sm:$0xff] }
  0x21   : > { %956 = vmatprep.subr.bf16.mxu1 %v1038_v10  ;;  %v1054_v26 = vld [vmem:[%s1160_s6 + $0xf0] sm:$0xff]   ;;  %v1058_v30 = vld [vmem:[%s1160_s6 + $0xf8] sm:$0xff]   ;;  %v282_v34 = vld [vmem:[%s1155_s27 + $0x8] sm:$0xff]  ;;  %v881_v35 = vcombine.low %v281_v33, %v281_v33  ;;  %v882_v36 = vcombine.high %v281_v33, %v281_v33 }
  0x22   : > { %v1055_v27 = vld [vmem:[%s1160_s6 + $0x30] sm:$0xff]   ;;  %v1059_v31 = vld [vmem:[%s1160_s6 + $0x38] sm:$0xff]   ;;  %v883_v37 = vcombine.low %v282_v34, %v282_v34  ;;  %v884_v38 = vcombine.high %v282_v34, %v282_v34  ;;  %v280_v47 = vld [vmem:[#allocation2] sm:$0xff] }
  0x23   : > { %935 = vmatpush3.bf16.msra.mxu0 %v1039_v11  ;;  %v1056_v28 = vld [vmem:[%s1160_s6 + $0xb0] sm:$0xff]   ;;  %v1060_v32 = vld [vmem:[%s1160_s6 + $0xb8] sm:$0xff]   ;;  %585 = vmatprep.mubr.bf16.mxu0 %v882_v36  ;;  %v1065_v52 = vld [vmem:[%s1238_s3] sm:$0xff] (!%p917_p7)  }
  0x24   : > { %957 = vmatpush3.bf16.msra.mxu1 %v1040_v12  ;;  %936 = vmatprep.subr.bf16.mxu0 %v1041_v13  ;;  %v1066_v54 = vld [vmem:[%s1238_s3 + $0x8] sm:$0xff] (!%p917_p7)   ;;  %v1067_v55 = vld [vmem:[%s1238_s3 + $0x10] sm:$0xff] (!%p917_p7)   ;;  %v918_v57 = vld [vmem:[%s1237_s2] ss:$0 sm:$0xff] (!%p917_p7) }
  0x25   : > { %958 = vmatprep.subr.bf16.mxu1 %v1042_v14  ;;  %625 = vmatprep.mubr.bf16.mxu1 %v884_v38  ;;  %v1068_v59 = vld [vmem:[%s1238_s3 + $0x18] sm:$0xff] (!%p917_p7)   ;;  %v1069_v3 = vld [vmem:[%s1239_s4] sm:$0xff] (!%p917_p7)   ;;  %v1070_v4 = vld [vmem:[%s1239_s4 + $0x8] sm:$0xff] (!%p917_p7)  }
  0x27   : > { %937 = vmatpush3.bf16.msra.mxu0 %v1043_v15 }
  0x28   : > { %959 = vmatpush3.bf16.msra.mxu1 %v1044_v16  ;;  %938 = vmatprep.subr.bf16.mxu0 %v1045_v17 }
  0x29   : > { %960 = vmatprep.subr.bf16.mxu1 %v1046_v18 }
  0x2b   : > { %939 = vmatpush3.bf16.msra.mxu0 %v1047_v19 }
  0x2c   : > { %961 = vmatpush3.bf16.msra.mxu1 %v1048_v20  ;;  %940 = vmatprep.subr.bf16.mxu0 %v1049_v21 }
  0x2d   : > { %962 = vmatprep.subr.bf16.mxu1 %v1050_v22 }
  0x2f   : > { %941 = vmatpush3.bf16.msra.mxu0 %v1051_v23 }
  0x30   : > { %963 = vmatpush3.bf16.msra.mxu1 %v1052_v24  ;;  %942 = vmatprep.subr.bf16.mxu0 %v1053_v25 }
  0x31   : > { %964 = vmatprep.subr.bf16.mxu1 %v1054_v26 }
  0x33   : > { %943 = vmatpush3.bf16.msra.mxu0 %v1055_v27 }
  0x34   : > { %965 = vmatpush3.bf16.msra.mxu1 %v1056_v28  ;;  %944 = vmatprep.subr.bf16.mxu0 %v1057_v29 }
  0x35   : > { %966 = vmatprep.subr.bf16.mxu1 %v1058_v30 }
  0x37   : > { %945 = vmatpush3.bf16.msra.mxu0 %v1059_v31 }
  0x38   : > { %967 = vmatpush3.bf16.msra.mxu1 %v1060_v32  ;;  %982 = vmatprep.subr.bf16.mxu0 (!%p917_p7), %v1098_v53 }
  0x39   : > { %994 = vmatprep.subr.bf16.mxu1 (!%p917_p7), %v1098_v53 }
  0x3a   : > { %586 = vmatmul.mubr.bf16.vlgmr.msra.gmra.mrb[0].mxu0 %v881_v35 }
  0x3b   : > { %626 = vmatmul.mubr.bf16.vlgmr.msra.gmra.mrb[0].mxu1 %v883_v37  ;;  %983 = vmatpush3.bf16.msra.mxu0 (!%p917_p7), %v1065_v52 }
  0x3c   : > { %990 = vmatprep.mubr.msk.bf16.mxu0 (!%p917_p7), %vm1099_vm2, %v1098_v53  ;;  %984 = vmatprep.subr.bf16.mxu0 (!%p917_p7), %v1098_v53 }
  0x3d   : > { %998 = vmatprep.mubr.msk.bf16.mxu1 (!%p917_p7), %vm1099_vm2, %v1098_v53  ;;  %995 = vmatpush3.bf16.msra.mxu1 (!%p917_p7), %v1069_v3 }
  0x3e   : > { %996 = vmatprep.subr.bf16.mxu1 (!%p917_p7), %v1098_v53 }
  0x3f   : > { %985 = vmatpush3.bf16.msra.mxu0 (!%p917_p7), %v1066_v54 }
  0x40   : > { %986 = vmatprep.subr.bf16.mxu0 (!%p917_p7), %v1098_v53 }
  0x41   : > { %997 = vmatpush3.bf16.msra.mxu1 (!%p917_p7), %v1070_v4 }
  0x43   : > { %987 = vmatpush3.bf16.msra.mxu0 (!%p917_p7), %v1067_v55 }
  0x44   : > { %988 = vmatprep.subr.bf16.mxu0 (!%p917_p7), %v1098_v53 }
  0x47   : > { %989 = vmatpush3.bf16.msra.mxu0 (!%p917_p7), %v1068_v59 }
 0x10d   : > { %v946_v39 = vpop.f32.mrb[0].mxu0 }
 0x10e   : > { %v968_v40 = vpop.f32.mrb[0].mxu1  ;;  %v947_v41 = vpop.f32.mrb[1].mxu0 }
 0x10f   : > { %v969_v42 = vpop.f32.mrb[1].mxu1  ;;  %v948_v43 = vadd.f32 %v947_v41, %v946_v39  ;;  %v949_v45 = vpop.f32.mrb[2].mxu0 }
 0x110   : > { %v970_v44 = vadd.f32 %v969_v42, %v968_v40  ;;  %v971_v46 = vpop.f32.mrb[2].mxu1  ;;  %v950_v48 = vpop.f32.mrb[3].mxu0  ;;  %639 = sbr.rel (%p917_p7) target bundleno = 879 (0x36f), region = 48 }
 0x111   : > { %v972_v49 = vpop.f32.mrb[3].mxu1 }
 0x112   : > { %v628_v50 = vadd.f32 %v970_v44, %v948_v43 }
 0x114   : > { %v633_v51 = vadd.f32 %v628_v50, %v280_v47 }
 0x116   : > { %635 = vst.msk [vmem:[#allocation2] sm:$0xff] %vm634_vm1, %v633_v51 }
 0x11d   : > { %v640_v56 = vld [vmem:[#allocation2] sm:$0xff] }
 0x11e   : > { %v648_v58 = vadd.f32 %v918_v57, %v640_v56 }
 0x120   : > { %v649_v60 = vpack.c.bf16 %v648_v58, %v648_v58 }
 0x122   : > { %991 = vmatmul.mubr.msk.bf16.vlgmr.msra.gmra.mrb[0].mxu0 %vm634_vm1, %v649_v60 }
 0x1f5   : > { %v719_v61 = vpop.f32.mrb[0].mxu0 }
 0x1f6   : > { %v992_v62 = vpop.f32.mrb[1].mxu0  ;;  %v725_v63 = vmul.f32 %v719_v61, %v719_v61 }
 0x1f7   : > { %v722_v0 = vpop.f32.mrb[2].mxu0 }
 0x1f8   : > { %v993_v1 = vpop.f32.mrb[3].mxu0  ;;  %v727_v2 = vsel %vm726_vm3, %v725_v63, 0.0 }
 0x1f9   : > { %728 = vadd.xlane.f32.xlu0 %v727_v2 }
 0x286   : > { %v729_v5 = vpop.xlane.xlu0 %728 }
 0x287   : > { %v730_v6 = vmax.f32 %v729_v5, 1e-24 }
 0x289   : > { %1071 = vrsqrt.f32 %v730_v6 }
 0x293   : > { %v1072_v7 = vpop.eup %1071 }
 0x294   : > { %v732_v8 = vmul.f32 %v1072_v7, %v719_v61 }
 0x296   : > { %v733_v9 = vpack.c.bf16 %v732_v8, %v732_v8 }
 0x298   : > { %999 = vmatmul.mubr.msk.bf16.vlgmr.msra.gmra.mrb[0].mxu1 %vm726_vm3, %v733_v9 }
 0x36b   : > { %v787_v10 = vpop.f32.mrb[0].mxu1 }
 0x36c   : > { %794 = vst.msk [vmem:[%s1240_s5] sm:$0xff] %vm793_vm4, %v787_v10  ;;  %v1000_v11 = vpop.f32.mrb[1].mxu1 }
 0x36d   : > { %v790_v12 = vpop.f32.mrb[2].mxu1 }
 0x36e   : > { %v1001_v13 = vpop.f32.mrb[3].mxu1 }
 0x36f PF: > { %s15_s20 = sadd.s32 1, %s1095_s20   ;;  %s1241_s18 = smov %s1091_s19 }
 0x370   : > { %p12_p8 = scmp.ge.s32.totalorder %s15_s20, 4   ;;  %s1242_s19 = smov %s1244_s21 }
 0x372   :  { %14 = sbr.rel (!%p12_p8) target bundleno = 2 (0x2), region = 81 }

</bundles_post_ra>
